<compile_context>
chip_gen: v7x
topology: tpu7x:2x2x1
jax: 0.10.0
libtpu: 0.0.40
codegen_flags: <defaults>
</compile_context>

<pallas_src>
import functools

import jax
import jax.numpy as jnp
from jax import lax
from jax.experimental import pallas as pl
from jax.experimental.pallas import tpu as pltpu


def gcn_kernel(bd_ref, x_ref, w1_ref, b1_ref, w2_ref, b2_ref, out_ref, *,
               mxu_dtype=jnp.bfloat16):
    # bd_ref : (1, GN, GN) block-diagonal adjacency (bf16, exact 0/1),
    #          destination-major: bd[(g, dst), (g, src)]
    # x_ref  : (G, N, F_in) node features (unpadded feature dim)
    # w1_ref : (F_in, Hp)   b1_ref: (1, Hp)
    # w2_ref : (Hp, Hp)     b2_ref: (1, Hp)
    # out_ref: (1, G, Hp)   pooled per-graph embeddings (lane-padded)
    G, N, F_in = x_ref.shape
    GN = G * N
    Hp = w1_ref.shape[-1]

    bd = bd_ref[0].astype(jnp.float32)                               # (GN, GN)
    # Degrees straight from the block-diagonal matrix (off-diag blocks are 0):
    #   row sums -> in-degree of each destination node
    #   col sums -> out-degree of each source node
    # Clamped to min 1 (DGL behaviour).  rsqrt goes to the EUP slot.
    in_deg = jnp.maximum(jnp.sum(bd, axis=1, keepdims=True), 1.0)    # (GN, 1)
    out_deg = jnp.maximum(jnp.sum(bd, axis=0, keepdims=True), 1.0)   # (1, GN)
    in_norm = lax.rsqrt(in_deg)                                      # (GN, 1), f32
    # Fold D_out^{-1/2} into the aggregation operand once (lane-aligned column
    # scale); single cast to the MXU dtype, reused by both layers.
    bd_mm = (bd * lax.rsqrt(out_deg)).astype(mxu_dtype)              # (GN, GN)

    x = x_ref[...].reshape(GN, F_in)                                 # f32

    def graph_conv(h, w_ref, b_ref):
        # Feature transform first (commutes with the diagonal degree scalings),
        # so the aggregation matmul runs on lane-dense (GN, Hp) operands.
        t = jnp.dot(h.astype(mxu_dtype), w_ref[...].astype(mxu_dtype),
                    preferred_element_type=jnp.float32)              # (GN, Hp)
        agg = jnp.dot(bd_mm, t.astype(mxu_dtype),
                      preferred_element_type=jnp.float32)            # (GN, Hp)
        return agg * in_norm + b_ref[...]                            # f32

    h1 = jnp.maximum(graph_conv(x, w1_ref, b1_ref), 0.0)             # ReLU
    h2 = graph_conv(h1, w2_ref, b2_ref)

    # dgl.mean_nodes: mean over the N node rows of each graph (sublane reduce).
    pooled = jnp.sum(h2.reshape(G, N, Hp), axis=1) * (1.0 / N)       # (G, Hp)
    out_ref[...] = pooled.reshape(1, G, Hp)


def _round_up(v, m):
    return ((v + m - 1) // m) * m


def _pad2(m, rows, cols):
    return jnp.pad(m, ((0, rows - m.shape[0]), (0, cols - m.shape[1])))


def _choose_graphs_per_step(B, N, target_gn):
    # Fill the MXU contraction / row depth with G*N (128 on v5e, 256 on
    # v6e/v7x); keep G a multiple of 8 so the pooled (G, Hp) output block is
    # sublane-dense.  No silent divisor fallback — the batch is padded with
    # dummy graphs instead.
    G = max(1, target_gn // N)
    G = min(G, _round_up(B, 8))          # no point going far past the batch
    if G >= 8:
        G -= G % 8
    return max(G, 1)


def _block_diag_adjacency(A, G):
    """Pack groups of G graphs into destination-major block-diagonal bf16
    aggregation matrices: BD[p, g*N + dst, g*N + src] = A[p*G + g, src, dst].
    (The per-graph transpose is folded into the packing; values are exactly
    0/1 so bf16 is lossless.)"""
    B_pad, N, _ = A.shape
    P = B_pad // G
    A_grp = A.reshape(P, G, N, N).astype(jnp.float32)
    eye_g = jnp.eye(G, dtype=jnp.float32)
    bd = jnp.einsum("pgsd,gh->pgdhs", A_grp, eye_g)      # (P, G, N, G, N)
    return bd.reshape(P, G * N, G * N).astype(jnp.bfloat16)


def gcn_forward(A, X, params, *, mxu_dtype=jnp.bfloat16, target_gn=256):
    """A: (B, N, N) with A[g, i, j] = 1 iff directed edge i -> j.
       X: (B, N, F_in) node features."""
    B, N, _ = A.shape
    F_in = X.shape[-1]
    H = params["w1"].shape[1]

    LANE = 128
    Hp = _round_up(H, LANE)              # lane-pad hidden dim (weights only)

    G = _choose_graphs_per_step(B, N, target_gn)
    num_groups = -(-B // G)              # ceil div
    B_pad = num_groups * G
    if B_pad > B:                        # dummy (empty) graphs; sliced off below
        A = jnp.pad(A, ((0, B_pad - B), (0, 0), (0, 0)))
        X = jnp.pad(X, ((0, B_pad - B), (0, 0), (0, 0)))
    GN = G * N

    BD = _block_diag_adjacency(A, G)                     # (num_groups, GN, GN) bf16
    Xf = X.astype(jnp.float32)                           # (B_pad, N, F_in), no lane pad
    W1p = _pad2(params["w1"].astype(jnp.float32), F_in, Hp)
    b1p = _pad2(params["b1"].astype(jnp.float32), 1, Hp)
    W2p = _pad2(params["w2"].astype(jnp.float32), Hp, Hp)
    b2p = _pad2(params["b2"].astype(jnp.float32), 1, Hp)

    kernel = functools.partial(gcn_kernel, mxu_dtype=mxu_dtype)

    # NOTE: the constant-index weight/bias inputs could be single-buffered
    # (pipeline_mode=pl.Buffered(1)) and vmem_limit_bytes set explicitly if N
    # grows to where the (GN, GN) adjacency presses the v7x 64 MiB VMEM; at
    # these sizes the defaults are well within budget.
    g_emb = pl.pallas_call(
        kernel,
        out_shape=jax.ShapeDtypeStruct((num_groups, G, Hp), jnp.float32),
        grid_spec=pltpu.PrefetchScalarGridSpec(
            num_scalar_prefetch=0,
            grid=(num_groups,),
            in_specs=[
                pl.BlockSpec((1, GN, GN), lambda i: (i, 0, 0)),    # packed adjacency
                pl.BlockSpec((G, N, F_in), lambda i: (i, 0, 0)),   # X (unpadded lanes)
                pl.BlockSpec((F_in, Hp), lambda i: (0, 0)),        # W1
                pl.BlockSpec((1, Hp), lambda i: (0, 0)),           # b1
                pl.BlockSpec((Hp, Hp), lambda i: (0, 0)),          # W2
                pl.BlockSpec((1, Hp), lambda i: (0, 0)),           # b2
            ],
            out_specs=pl.BlockSpec((1, G, Hp), lambda i: (i, 0, 0)),
        ),
        compiler_params=pltpu.CompilerParams(
            dimension_semantics=("parallel",)),
    )(BD, Xf, W1p, b1p, W2p, b2p)

    # Lane-dense kernel output -> tiny readout (Linear(H,1) + Sigmoid) in XLA.
    g_emb = g_emb.reshape(B_pad, Hp)[:B, :H]
    logits = g_emb @ params["w_ro"] + params["b_ro"]
    return jax.nn.sigmoid(logits).reshape(B)             # probs.squeeze() -> [B]


def gcn_reference(A, X, params):
    """Pure-JAX reference of the same math (sanity check)."""
    out_deg = jnp.maximum(A.sum(axis=2, keepdims=True), 1.0)            # (B,N,1)
    in_deg = jnp.maximum(A.sum(axis=1, keepdims=True), 1.0)             # (B,1,N)
    ns = lax.rsqrt(out_deg)
    nd = lax.rsqrt(in_deg).transpose(0, 2, 1)                           # (B,N,1)
    at = A.transpose(0, 2, 1)

    def conv(h, w, b):
        agg = jnp.einsum("bij,bjf->bif", at, h * ns) * nd
        return agg @ w + b

    h1 = jax.nn.relu(conv(X, params["w1"], params["b1"]))
    h2 = conv(h1, params["w2"], params["b2"])
    g = h2.mean(axis=1)                                                 # (B,H)
    return jax.nn.sigmoid(g @ params["w_ro"] + params["b_ro"]).reshape(-1)


if __name__ == "__main__":
    B, N, F_in, H = 8, 16, 8, 32   # G*N = 128: one dense grid step

    key = jax.random.PRNGKey(0)
    k_a, k_x, k_w1, k_b1, k_w2, k_b2, k_wr, k_br = jax.random.split(key, 8)

    # deterministic synthetic graph batch + parameters (no checkpoint load)
    A = jax.random.bernoulli(k_a, 0.3, (B, N, N)).astype(jnp.float32)
    X = jax.random.normal(k_x, (B, N, F_in), dtype=jnp.float32)

    params = {
        "w1": jax.random.normal(k_w1, (F_in, H), dtype=jnp.float32) * 0.1,
        "b1": jax.random.normal(k_b1, (1, H), dtype=jnp.float32) * 0.1,
        "w2": jax.random.normal(k_w2, (H, H), dtype=jnp.float32) * 0.1,
        "b2": jax.random.normal(k_b2, (1, H), dtype=jnp.float32) * 0.1,
        "w_ro": jax.random.normal(k_wr, (H, 1), dtype=jnp.float32) * 0.1,
        "b_ro": jax.random.normal(k_br, (1, 1), dtype=jnp.float32) * 0.1,
    }

    ref = gcn_reference(A, X, params)

    # f32 MXU operands: numerically matches the pure-JAX reference.
    probs_f32 = gcn_forward(A, X, params, mxu_dtype=jnp.float32)
    jax.block_until_ready(probs_f32)
    assert probs_f32.shape == (B,)
    assert jnp.allclose(probs_f32, ref, atol=1e-4, rtol=1e-4)

    # Default path: bf16 MXU operands with f32 accumulation (fast on v5e/v6e/v7x).
    probs = gcn_forward(A, X, params)
    jax.block_until_ready(probs)
    assert probs.shape == (B,)
    assert jnp.allclose(probs, ref, atol=5e-2, rtol=5e-2)

    print("KERNEL_OK")
</pallas_src>

<mosaic_0001>
module attributes {stable_mosaic.version = 11 : i64} {
  func.func @gcn_kernel(%arg0: i32, %arg1: memref<1x128x128xbf16, #tpu.memory_space<vmem>>, %arg2: memref<8x16x8xf32, #tpu.memory_space<vmem>>, %arg3: memref<8x128xf32, #tpu.memory_space<vmem>>, %arg4: memref<1x128xf32, #tpu.memory_space<vmem>>, %arg5: memref<128x128xf32, #tpu.memory_space<vmem>>, %arg6: memref<1x128xf32, #tpu.memory_space<vmem>>, %arg7: memref<1x8x128xf32, #tpu.memory_space<vmem>>) attributes {dimension_semantics = [#tpu.dimension_semantics<parallel>], iteration_bounds = array<i64: 1>, scalar_prefetch = 0 : i64, scratch_operands = 0 : i64, tpu.core_type = #tpu.core_type<tc>, window_params = [{transform_indices = @transform_0, window_bounds = array<i64: 1, 128, 128>}, {transform_indices = @transform_1, window_bounds = array<i64: 8, 16, 8>}, {pipeline_mode = #tpu.pipeline_mode<synchronous>, transform_indices = @transform_2, window_bounds = array<i64: 8, 128>}, {pipeline_mode = #tpu.pipeline_mode<synchronous>, transform_indices = @transform_3, window_bounds = array<i64: 1, 128>}, {pipeline_mode = #tpu.pipeline_mode<synchronous>, transform_indices = @transform_4, window_bounds = array<i64: 128, 128>}, {pipeline_mode = #tpu.pipeline_mode<synchronous>, transform_indices = @transform_5, window_bounds = array<i64: 1, 128>}, {transform_indices = @transform_6, window_bounds = array<i64: 1, 8, 128>}]} {
    %c0 = arith.constant 0 : index
    %c0_0 = arith.constant 0 : index
    %c0_1 = arith.constant 0 : index
    %0 = vector.load %arg1[%c0, %c0_0, %c0_1] : memref<1x128x128xbf16, #tpu.memory_space<vmem>>, vector<1x128x128xbf16>
    %1 = vector.shape_cast %0 : vector<1x128x128xbf16> to vector<128x128xbf16>
    %2 = arith.extf %1 : vector<128x128xbf16> to vector<128x128xf32>
    %cst = arith.constant dense<0.000000e+00> : vector<128xf32>
    %3 = vector.multi_reduction <add>, %2, %cst [1] : vector<128x128xf32> to vector<128xf32>
    %4 = vector.shape_cast %3 : vector<128xf32> to vector<128x1xf32>
    %cst_2 = arith.constant 1.000000e+00 : f32
    %5 = vector.broadcast %cst_2 : f32 to vector<128x1xf32>
    %6 = arith.maximumf %4, %5 : vector<128x1xf32>
    %cst_3 = arith.constant dense<0.000000e+00> : vector<128xf32>
    %7 = vector.multi_reduction <add>, %2, %cst_3 [0] : vector<128x128xf32> to vector<128xf32>
    %8 = vector.shape_cast %7 : vector<128xf32> to vector<1x128xf32>
    %cst_4 = arith.constant 1.000000e+00 : f32
    %9 = vector.broadcast %cst_4 : f32 to vector<1x128xf32>
    %10 = arith.maximumf %8, %9 : vector<1x128xf32>
    %11 = math.rsqrt %6 : vector<128x1xf32>
    %12 = math.rsqrt %10 : vector<1x128xf32>
    %13 = vector.broadcast %12 : vector<1x128xf32> to vector<128x128xf32>
    %14 = arith.mulf %2, %13 : vector<128x128xf32>
    %c0_5 = arith.constant 0 : index
    %c0_6 = arith.constant 0 : index
    %c0_7 = arith.constant 0 : index
    %15 = vector.load %arg2[%c0_5, %c0_6, %c0_7] : memref<8x16x8xf32, #tpu.memory_space<vmem>>, vector<8x16x8xf32>
    %16 = vector.shape_cast %15 : vector<8x16x8xf32> to vector<128x8xf32>
    %c0_8 = arith.constant 0 : index
    %c0_9 = arith.constant 0 : index
    %17 = vector.load %arg3[%c0_8, %c0_9] : memref<8x128xf32, #tpu.memory_space<vmem>>, vector<8x128xf32>
    %cst_10 = arith.constant dense<0.000000e+00> : vector<128x128xf32>
    %18 = tpu.matmul %16, %17, %cst_10 {dimension_numbers = #tpu.dot_dimension_numbers<[1], [0], [0], [1], [0, 0, 1, 1], [], []>} : vector<128x8xf32>, vector<8x128xf32>, vector<128x128xf32> -> vector<128x128xf32>
    %cst_11 = arith.constant dense<0.000000e+00> : vector<128x128xf32>
    %19 = tpu.matmul %14, %18, %cst_11 {dimension_numbers = #tpu.dot_dimension_numbers<[1], [0], [0], [1], [0, 0, 1, 1], [], []>} : vector<128x128xf32>, vector<128x128xf32>, vector<128x128xf32> -> vector<128x128xf32>
    %20 = vector.broadcast %11 : vector<128x1xf32> to vector<128x128xf32>
    %21 = arith.mulf %19, %20 : vector<128x128xf32>
    %c0_12 = arith.constant 0 : index
    %c0_13 = arith.constant 0 : index
    %22 = vector.load %arg4[%c0_12, %c0_13] : memref<1x128xf32, #tpu.memory_space<vmem>>, vector<1x128xf32>
    %23 = vector.broadcast %22 : vector<1x128xf32> to vector<128x128xf32>
    %24 = arith.addf %21, %23 : vector<128x128xf32>
    %cst_14 = arith.constant 0.000000e+00 : f32
    %25 = vector.broadcast %cst_14 : f32 to vector<128x128xf32>
    %26 = arith.maximumf %24, %25 : vector<128x128xf32>
    %c0_15 = arith.constant 0 : index
    %c0_16 = arith.constant 0 : index
    %27 = vector.load %arg5[%c0_15, %c0_16] : memref<128x128xf32, #tpu.memory_space<vmem>>, vector<128x128xf32>
    %cst_17 = arith.constant dense<0.000000e+00> : vector<128x128xf32>
    %28 = tpu.matmul %26, %27, %cst_17 {dimension_numbers = #tpu.dot_dimension_numbers<[1], [0], [0], [1], [0, 0, 1, 1], [], []>} : vector<128x128xf32>, vector<128x128xf32>, vector<128x128xf32> -> vector<128x128xf32>
    %cst_18 = arith.constant dense<0.000000e+00> : vector<128x128xf32>
    %29 = tpu.matmul %14, %28, %cst_18 {dimension_numbers = #tpu.dot_dimension_numbers<[1], [0], [0], [1], [0, 0, 1, 1], [], []>} : vector<128x128xf32>, vector<128x128xf32>, vector<128x128xf32> -> vector<128x128xf32>
    %30 = vector.broadcast %11 : vector<128x1xf32> to vector<128x128xf32>
    %31 = arith.mulf %29, %30 : vector<128x128xf32>
    %c0_19 = arith.constant 0 : index
    %c0_20 = arith.constant 0 : index
    %32 = vector.load %arg6[%c0_19, %c0_20] : memref<1x128xf32, #tpu.memory_space<vmem>>, vector<1x128xf32>
    %33 = vector.broadcast %32 : vector<1x128xf32> to vector<128x128xf32>
    %34 = arith.addf %31, %33 : vector<128x128xf32>
    %35 = vector.shape_cast %34 : vector<128x128xf32> to vector<8x16x128xf32>
    %cst_21 = arith.constant dense<0.000000e+00> : vector<8x128xf32>
    %36 = vector.multi_reduction <add>, %35, %cst_21 [1] : vector<8x16x128xf32> to vector<8x128xf32>
    %cst_22 = arith.constant 6.250000e-02 : f32
    %37 = vector.broadcast %cst_22 : f32 to vector<8x128xf32>
    %38 = arith.mulf %36, %37 : vector<8x128xf32>
    %39 = vector.shape_cast %38 : vector<8x128xf32> to vector<1x8x128xf32>
    %c0_23 = arith.constant 0 : index
    %c0_24 = arith.constant 0 : index
    %c0_25 = arith.constant 0 : index
    %40 = vector.load %arg7[%c0_23, %c0_24, %c0_25] : memref<1x8x128xf32, #tpu.memory_space<vmem>>, vector<1x8x128xf32>
    tpu.vector_store %arg7[%c0_23, %c0_24, %c0_25], %39 {strides = array<i32>} : memref<1x8x128xf32, #tpu.memory_space<vmem>>, vector<1x8x128xf32>,
    return
  }
  func.func @transform_0(%arg0: i32) -> (i32, i32, i32) {
    %c0_i32 = arith.constant 0 : i32
    %c0_i32_0 = arith.constant 0 : i32
    %c0_i32_1 = arith.constant 0 : i32
    return %arg0, %c0_i32, %c0_i32_0 : i32, i32, i32
  }
  func.func @transform_1(%arg0: i32) -> (i32, i32, i32) {
    %c0_i32 = arith.constant 0 : i32
    %c0_i32_0 = arith.constant 0 : i32
    %c0_i32_1 = arith.constant 0 : i32
    return %arg0, %c0_i32, %c0_i32_0 : i32, i32, i32
  }
  func.func @transform_2(%arg0: i32) -> (i32, i32) {
    %c0_i32 = arith.constant 0 : i32
    %c0_i32_0 = arith.constant 0 : i32
    %c0_i32_1 = arith.constant 0 : i32
    return %c0_i32, %c0_i32_0 : i32, i32
  }
  func.func @transform_3(%arg0: i32) -> (i32, i32) {
    %c0_i32 = arith.constant 0 : i32
    %c0_i32_0 = arith.constant 0 : i32
    %c0_i32_1 = arith.constant 0 : i32
    return %c0_i32, %c0_i32_0 : i32, i32
  }
  func.func @transform_4(%arg0: i32) -> (i32, i32) {
    %c0_i32 = arith.constant 0 : i32
    %c0_i32_0 = arith.constant 0 : i32
    %c0_i32_1 = arith.constant 0 : i32
    return %c0_i32, %c0_i32_0 : i32, i32
  }
  func.func @transform_5(%arg0: i32) -> (i32, i32) {
    %c0_i32 = arith.constant 0 : i32
    %c0_i32_0 = arith.constant 0 : i32
    %c0_i32_1 = arith.constant 0 : i32
    return %c0_i32, %c0_i32_0 : i32, i32
  }
  func.func @transform_6(%arg0: i32) -> (i32, i32, i32) {
    %c0_i32 = arith.constant 0 : i32
    %c0_i32_0 = arith.constant 0 : i32
    %c0_i32_1 = arith.constant 0 : i32
    return %arg0, %c0_i32, %c0_i32_0 : i32, i32, i32
  }
}

</mosaic_0001>

<bundles_post_ra>
// kernel: tpu_custom_call.1
= control target key start
LH: loop header
LB: loop body
LE: loop exit
PB: predicated region body
PF: predicated region fallthrough
CT: control target
= control target key end

     0   :  { %vm176_vm0 = vcmask 64512   ;;  %s1924_s0 = inlined_call_operand.vmem [shape: bf16[1,128,128], index: 0, kind: input, shape index: {}]   ;;  %s1925_s1 = inlined_call_operand.vmem [shape: f32[8,16,8], index: 1, kind: input, shape index: {}]   ;;  %s1926_s2 = inlined_call_operand.vmem [shape: f32[8,128], index: 2, kind: input, shape index: {}]   ;;  %s1927_s3 = inlined_call_operand.vmem [shape: f32[1,128], index: 3, kind: input, shape index: {}]   ;;  %s1928_s4 = inlined_call_operand.vmem [shape: f32[128,128], index: 4, kind: input, shape index: {}]   ;;  %s1929_s5 = inlined_call_operand.vmem [shape: f32[1,128], index: 5, kind: input, shape index: {}]   ;;  %s1930_s6 = inlined_call_operand.hbm [shape: f32[1,8,128], index: 6, kind: output, shape index: {}]  }
   0x1   :  { %v175_v0 = vld [vmem:[%s1926_s2] sm:$0xff]  ;;  %v160_v2 = vld [vmem:[%s1925_s1 + $0x8] sm:$0xff]  ;;  %v161_v3 = vld [vmem:[%s1925_s1 + $0x10] sm:$0xff] }
   0x2   :  { %v159_v1 = vld [vmem:[%s1925_s1] sm:$0xff]  ;;  %1187 = vmatprep.subr.mxu0 %v175_v0  ;;  %v162_v4 = vld [vmem:[%s1925_s1 + $0x18] sm:$0xff] }
   0x3   :  { %1189 = vmatprep.mubr.msk.f32.mxu0 %vm176_vm0, %v159_v1  ;;  %1188 = vmatpush3.msra.mxu0 %v175_v0  ;;  %v163_v5 = vld [vmem:[%s1925_s1 + $0x20] sm:$0xff] }
   0x4   :  { %1190 = vmatmul.mubr.msk.f32.vlgmr.msra.gmra.mrb[0].mxu0 %vm176_vm0, %v160_v2 }
   0x5   :  { %1192 = vmatprep.mubr.msk.f32.mxu0 %vm176_vm0, %v161_v3 }
   0x6   :  { %11 = vsyncpa [#allocation3], 0  ;;  %v164_v6 = vld [vmem:[%s1925_s1 + $0x28] sm:$0xff]  ;;  %v165_v7 = vld [vmem:[%s1925_s1 + $0x30] sm:$0xff]  ;;  %vm987_vm1 = vcmask 1041409   ;;  %vm989_vm2 = vcmask 1042434  }
   0x7   :  { %v166_v8 = vld [vmem:[%s1925_s1 + $0x38] sm:$0xff]  ;;  %v167_v9 = vld [vmem:[%s1925_s1 + $0x40] sm:$0xff]  ;;  %v168_v10 = vld [vmem:[%s1925_s1 + $0x48] sm:$0xff]  ;;  %vm991_vm3 = vcmask 1043459   ;;  %vm993_vm4 = vcmask 1044484   ;;  %vm995_vm5 = vcmask 1045509  }
   0x8   :  { %1193 = vmatmul.mubr.msk.f32.gmra.mrb[2].mxu0 %vm176_vm0, %v162_v4  ;;  %v169_v11 = vld [vmem:[%s1925_s1 + $0x50] sm:$0xff]  ;;  %v170_v12 = vld [vmem:[%s1925_s1 + $0x58] sm:$0xff]  ;;  %v171_v13 = vld [vmem:[%s1925_s1 + $0x60] sm:$0xff]  ;;  %vm997_vm6 = vcmask 1046534   ;;  %vm999_vm7 = vcmask 1047559  }
   0x9   :  { %1195 = vmatprep.mubr.msk.f32.mxu0 %vm176_vm0, %v163_v5  ;;  %v172_v14 = vld [vmem:[%s1925_s1 + $0x68] sm:$0xff]  ;;  %v173_v15 = vld [vmem:[%s1925_s1 + $0x70] sm:$0xff]  ;;  %v174_v16 = vld [vmem:[%s1925_s1 + $0x78] sm:$0xff] }
   0xa   :  { %v1036_v17 = vld [vmem:[%s1924_s0] sm:$0xff]   ;;  %v1067_v20 = vld [vmem:[%s1924_s0 + $0x8] sm:$0xff]   ;;  %v1068_v25 = vld [vmem:[%s1924_s0 + $0x10] sm:$0xff]  }
   0xb   :  { %v1658_v18 = vunpack.c.l.bf16 %v1036_v17  ;;  %v1660_v19 = vunpack.c.h.bf16 %v1036_v17  ;;  %v1665_v21 = vunpack.c.l.bf16 %v1067_v20  ;;  %v1042_v23 = vunpack.c.h.bf16 %v1067_v20  ;;  %v1069_v30 = vld [vmem:[%s1924_s0 + $0x18] sm:$0xff]   ;;  %v1070_v35 = vld [vmem:[%s1924_s0 + $0x20] sm:$0xff]   ;;  %v1071_v40 = vld [vmem:[%s1924_s0 + $0x28] sm:$0xff]  }
   0xc   :  { %1196 = vmatmul.mubr.msk.f32.gmra.mrb[4].mxu0 %vm176_vm0, %v164_v6  ;;  %v1045_v26 = vunpack.c.l.bf16 %v1068_v25  ;;  %v1046_v28 = vunpack.c.h.bf16 %v1068_v25  ;;  %v1049_v31 = vunpack.c.l.bf16 %v1069_v30  ;;  %v1050_v33 = vunpack.c.h.bf16 %v1069_v30  ;;  %v1072_v45 = vld [vmem:[%s1924_s0 + $0x30] sm:$0xff]   ;;  %v1073_v50 = vld [vmem:[%s1924_s0 + $0x38] sm:$0xff]   ;;  %v571_v17 = vld [vmem:[%s1928_s4 + $0x8] sm:$0xff] }
   0xd   :  { %1198 = vmatprep.mubr.msk.f32.mxu0 %vm176_vm0, %v165_v7  ;;  %v104_v22 = vadd.f32 %v1660_v19, %v1658_v18  ;;  %56 = vadd.xlane.f32.xlu0 %v1658_v18  ;;  %v1053_v36 = vunpack.c.l.bf16 %v1070_v35  ;;  %v1054_v38 = vunpack.c.h.bf16 %v1070_v35  ;;  %v1057_v41 = vunpack.c.l.bf16 %v1071_v40  ;;  %v573_v20 = vld [vmem:[%s1928_s4 + $0x18] sm:$0xff]  ;;  %v576_v25 = vld [vmem:[%s1928_s4 + $0x30] sm:$0xff] }
   0xe   :  { %60 = vadd.xlane.f32.xlu1 %v1665_v21  ;;  %v1058_v43 = vunpack.c.h.bf16 %v1071_v40  ;;  %v1061_v46 = vunpack.c.l.bf16 %v1072_v45  ;;  %v1062_v48 = vunpack.c.h.bf16 %v1072_v45  ;;  %v1065_v51 = vunpack.c.l.bf16 %v1073_v50 }
   0xf   :  { %v105_v24 = vadd.f32 %v1665_v21, %v104_v22  ;;  %v1066_v53 = vunpack.c.h.bf16 %v1073_v50  ;;  %v574_v22 = vld [vmem:[%s1928_s4 + $0x20] sm:$0xff] }
  0x10   :  { %1199 = vmatmul.mubr.msk.f32.gmra.mrb[6].mxu0 %vm176_vm0, %v166_v8 }
  0x11   :  { %1201 = vmatprep.mubr.msk.f32.mxu0 %vm176_vm0, %v167_v9  ;;  %v106_v27 = vadd.f32 %v1042_v23, %v105_v24  ;;  %58 = vadd.xlane.f32.xlu0 %v1660_v19 }
  0x12   :  { %62 = vadd.xlane.f32.xlu1 %v1042_v23 }
  0x13   :  { %v107_v29 = vadd.f32 %v1045_v26, %v106_v27 }
  0x14   :  { %1202 = vmatmul.mubr.msk.f32.gmra.mrb[8].mxu0 %vm176_vm0, %v168_v10 }
  0x15   :  { %1204 = vmatprep.mubr.msk.f32.mxu0 %vm176_vm0, %v169_v11  ;;  %v108_v32 = vadd.f32 %v1046_v28, %v107_v29  ;;  %64 = vadd.xlane.f32.xlu0 %v1045_v26  ;;  %v579_v29 = vld [vmem:[%s1928_s4 + $0x48] sm:$0xff] }
  0x16   :  { %66 = vadd.xlane.f32.xlu1 %v1046_v28 }
  0x17   :  { %v109_v34 = vadd.f32 %v1049_v31, %v108_v32  ;;  %v581_v32 = vld [vmem:[%s1928_s4 + $0x58] sm:$0xff] }
  0x18   :  { %1205 = vmatmul.mubr.msk.f32.gmra.mrb[10].mxu0 %vm176_vm0, %v170_v12 }
  0x19   :  { %1207 = vmatprep.mubr.msk.f32.mxu0 %vm176_vm0, %v171_v13  ;;  %v110_v37 = vadd.f32 %v1050_v33, %v109_v34  ;;  %68 = vadd.xlane.f32.xlu0 %v1049_v31 }
  0x1a   :  { %70 = vadd.xlane.f32.xlu1 %v1050_v33 }
  0x1b   :  { %v111_v39 = vadd.f32 %v1053_v36, %v110_v37 }
  0x1c   :  { %1208 = vmatmul.mubr.msk.f32.gmra.mrb[12].mxu0 %vm176_vm0, %v172_v14 }
  0x1d   :  { %1210 = vmatprep.mubr.msk.f32.mxu0 %vm176_vm0, %v173_v15  ;;  %v112_v42 = vadd.f32 %v1054_v38, %v111_v39  ;;  %72 = vadd.xlane.f32.xlu0 %v1053_v36 }
  0x1e   :  { %74 = vadd.xlane.f32.xlu1 %v1054_v38 }
  0x1f   :  { %v113_v44 = vadd.f32 %v1057_v41, %v112_v42 }
  0x20   :  { %1211 = vmatmul.mubr.msk.f32.gmra.mrb[14].mxu0 %vm176_vm0, %v174_v16  ;;  %v570_v16 = vld [vmem:[%s1928_s4] sm:$0xff] }
  0x21   :  { %v114_v47 = vadd.f32 %v1058_v43, %v113_v44  ;;  %76 = vadd.xlane.f32.xlu0 %v1057_v41 }
  0x22   :  { %78 = vadd.xlane.f32.xlu1 %v1058_v43 }
  0x23   :  { %v115_v49 = vadd.f32 %v1061_v46, %v114_v47 }
  0x25   :  { %v116_v52 = vadd.f32 %v1062_v48, %v115_v49  ;;  %80 = vadd.xlane.f32.xlu0 %v1061_v46 }
  0x26   :  { %82 = vadd.xlane.f32.xlu1 %v1062_v48 }
  0x27   :  { %v117_v54 = vadd.f32 %v1065_v51, %v116_v52 }
  0x29   :  { %v118_v55 = vadd.f32 %v1066_v53, %v117_v54  ;;  %84 = vadd.xlane.f32.xlu0 %v1065_v51 }
  0x2a   :  { %86 = vadd.xlane.f32.xlu1 %v1066_v53 }
  0x2b   :  { %v119_v56 = vrot.slane %v118_v55, 4 }
  0x2d   :  { %v120_v57 = vadd.f32 %v119_v56, %v118_v55 }
  0x2f   :  { %v121_v58 = vrot.slane %v120_v57, 2 }
  0x31   :  { %v122_v59 = vadd.f32 %v121_v58, %v120_v57  ;;  %v582_v58 = vld [vmem:[%s1928_s4 + $0x60] sm:$0xff] }
  0x33   :  { %v123_v60 = vrot.slane %v122_v59, 1 }
  0x35   :  { %v124_v61 = vadd.f32 %v123_v60, %v122_v59  ;;  %v583_v59 = vld [vmem:[%s1928_s4 + $0x68] sm:$0xff] }
  0x36   :  { %v1437_v60 = vpack.c.bf16 %v583_v59, %v582_v58 }
  0x37   :  { %v125_v62 = vmax.f32 %v124_v61, 1.0  ;;  %v584_v61 = vld [vmem:[%s1928_s4 + $0x70] sm:$0xff] }
  0x39   :  { %1494 = vrsqrt.f32 %v125_v62  ;;  %v585_v62 = vld [vmem:[%s1928_s4 + $0x78] sm:$0xff] }
  0x43   :  { %v1495_v63 = vpop.eup %1494 }
  0x44   :  { %v1692_v0 = vmul.f32 %v1495_v63, %v1658_v18  ;;  %v1695_v1 = vmul.f32 %v1495_v63, %v1660_v19  ;;  %v1699_v2 = vmul.f32 %v1495_v63, %v1665_v21  ;;  %v1701_v3 = vmul.f32 %v1495_v63, %v1042_v23  ;;  %v572_v18 = vld [vmem:[%s1928_s4 + $0x10] sm:$0xff]  ;;  %v575_v23 = vld [vmem:[%s1928_s4 + $0x28] sm:$0xff] }
  0x45   :  { %v1703_v4 = vmul.f32 %v1495_v63, %v1045_v26  ;;  %v1705_v5 = vmul.f32 %v1495_v63, %v1046_v28  ;;  %v1707_v6 = vmul.f32 %v1495_v63, %v1049_v31  ;;  %v1709_v7 = vmul.f32 %v1495_v63, %v1050_v33  ;;  %v577_v26 = vld [vmem:[%s1928_s4 + $0x38] sm:$0xff]  ;;  %v578_v28 = vld [vmem:[%s1928_s4 + $0x40] sm:$0xff]  ;;  %v580_v31 = vld [vmem:[%s1928_s4 + $0x50] sm:$0xff] }
  0x46   :  { %1245 = vmatprep.mubr.f32.mxu1 %v1692_v0  ;;  %v1711_v8 = vmul.f32 %v1495_v63, %v1053_v36  ;;  %v1713_v9 = vmul.f32 %v1495_v63, %v1054_v38  ;;  %v1715_v10 = vmul.f32 %v1495_v63, %v1057_v41  ;;  %v1717_v11 = vmul.f32 %v1495_v63, %v1058_v43 }
  0x47   :  { %v1719_v12 = vmul.f32 %v1495_v63, %v1061_v46  ;;  %v1721_v13 = vmul.f32 %v1495_v63, %v1062_v48  ;;  %v1723_v14 = vmul.f32 %v1495_v63, %v1065_v51  ;;  %v1725_v15 = vmul.f32 %v1495_v63, %v1066_v53 }
  0x48   :  { %v1413_v19 = vpack.c.bf16 %v571_v17, %v570_v16  ;;  %v1417_v21 = vpack.c.bf16 %v573_v20, %v572_v18  ;;  %v1421_v24 = vpack.c.bf16 %v575_v23, %v574_v22  ;;  %v1425_v27 = vpack.c.bf16 %v577_v26, %v576_v25 }
  0x49   :  { %v1429_v30 = vpack.c.bf16 %v579_v29, %v578_v28  ;;  %v1433_v33 = vpack.c.bf16 %v581_v32, %v580_v31  ;;  %v1441_v63 = vpack.c.bf16 %v585_v62, %v584_v61 }
  0x4a   :  { %1414 = vmatprep.subr.bf16.mxu0 %v1413_v19 }
  0x4b   :  { %1416 = vmatpush3.bf16.msra.mxu0 %v1413_v19 }
  0x4c   :  { %1418 = vmatprep.subr.bf16.mxu0 %v1417_v21 }
  0x4f   :  { %1420 = vmatpush3.bf16.msra.mxu0 %v1417_v21 }
  0x50   :  { %1422 = vmatprep.subr.bf16.mxu0 %v1421_v24 }
  0x53   :  { %1424 = vmatpush3.bf16.msra.mxu0 %v1421_v24 }
  0x54   :  { %1426 = vmatprep.subr.bf16.mxu0 %v1425_v27 }
  0x57   :  { %1428 = vmatpush3.bf16.msra.mxu0 %v1425_v27 }
  0x58   :  { %1430 = vmatprep.subr.bf16.mxu0 %v1429_v30 }
  0x5b   :  { %1432 = vmatpush3.bf16.msra.mxu0 %v1429_v30 }
  0x5c   :  { %1434 = vmatprep.subr.bf16.mxu0 %v1433_v33 }
  0x5f   :  { %1436 = vmatpush3.bf16.msra.mxu0 %v1433_v33 }
  0x60   :  { %1438 = vmatprep.subr.bf16.mxu0 %v1437_v60 }
  0x63   :  { %1440 = vmatpush3.bf16.msra.mxu0 %v1437_v60 }
  0x64   :  { %1442 = vmatprep.subr.bf16.mxu0 %v1441_v63 }
  0x67   :  { %1444 = vmatpush3.bf16.msra.mxu0 %v1441_v63 }
  0x9a   :  { %v57_v16 = vpop.xlane.xlu0 %56 }
  0x9b   :  { %v88_v24 = vmax.f32 %v57_v16, 1.0 }
  0x9e   :  { %v59_v18 = vpop.xlane.xlu0 %58 }
  0x9f   :  { %v89_v21 = vmax.f32 %v59_v18, 1.0 }
  0xa1   :  { %1496 = vrsqrt.f32 %v89_v21 }
  0xa2   :  { %v65_v20 = vpop.xlane.xlu0 %64  ;;  %1498 = vrsqrt.f32 %v88_v24 }
  0xa3   :  { %v92_v30 = vmax.f32 %v65_v20, 1.0 }
  0xa6   :  { %v69_v23 = vpop.xlane.xlu0 %68 }
  0xa7   :  { %v94_v32 = vmax.f32 %v69_v23, 1.0 }
  0xaa   :  { %v73_v29 = vpop.xlane.xlu0 %72 }
  0xd7   :  { %v1191_v34 = vpop.f32.mrb[0].mxu0 }
  0xd8   :  { %v291_v35 = vpop.f32.mrb[1].mxu0 }
  0xd9   :  { %v1381_v36 = vpack.c.bf16 %v1191_v34, %v291_v35  ;;  %v1791_v34 = vpop.eup %1496  ;;  %v77_v35 = vpop.xlane.xlu0 %76 }
  0xdb   :  { %v1194_v37 = vpop.f32.mrb[2].mxu0  ;;  %1382 = vmatprep.subr.bf16.mxu1 %v1381_v36 }
  0xdc   :  { %v301_v38 = vpop.f32.mrb[3].mxu0  ;;  %1384 = vmatpush3.bf16.msra.mxu1 %v1381_v36 }
  0xdd   :  { %v1385_v39 = vpack.c.bf16 %v1194_v37, %v301_v38  ;;  %v1796_v37 = vld [vmem:[%s1927_s3] ss:$0 sm:$0xff] }
  0xdf   :  { %v1197_v40 = vpop.f32.mrb[4].mxu0  ;;  %1386 = vmatprep.subr.bf16.mxu1 %v1385_v39 }
  0xe0   :  { %v311_v41 = vpop.f32.mrb[5].mxu0  ;;  %1388 = vmatpush3.bf16.msra.mxu1 %v1385_v39  ;;  %v1798_v39 = vpop.eup %1498 }
  0xe1   :  { %v1389_v42 = vpack.c.bf16 %v1197_v40, %v311_v41 }
  0xe3   :  { %v1200_v43 = vpop.f32.mrb[6].mxu0  ;;  %1390 = vmatprep.subr.bf16.mxu1 %v1389_v42 }
  0xe4   :  { %v321_v44 = vpop.f32.mrb[7].mxu0  ;;  %1392 = vmatpush3.bf16.msra.mxu1 %v1389_v42  ;;  %v96_v42 = vmax.f32 %v73_v29, 1.0 }
  0xe5   :  { %v1393_v45 = vpack.c.bf16 %v1200_v43, %v321_v44 }
  0xe7   :  { %v1203_v46 = vpop.f32.mrb[8].mxu0  ;;  %1394 = vmatprep.subr.bf16.mxu1 %v1393_v45 }
  0xe8   :  { %v331_v47 = vpop.f32.mrb[9].mxu0  ;;  %1396 = vmatpush3.bf16.msra.mxu1 %v1393_v45 }
  0xe9   :  { %v1397_v48 = vpack.c.bf16 %v1203_v46, %v331_v47 }
  0xeb   :  { %v1206_v49 = vpop.f32.mrb[10].mxu0  ;;  %1398 = vmatprep.subr.bf16.mxu1 %v1397_v48 }
  0xec   :  { %v341_v50 = vpop.f32.mrb[11].mxu0  ;;  %1400 = vmatpush3.bf16.msra.mxu1 %v1397_v48 }
  0xed   :  { %v1401_v51 = vpack.c.bf16 %v1206_v49, %v341_v50  ;;  %v81_v50 = vpop.xlane.xlu0 %80 }
  0xef   :  { %v1209_v52 = vpop.f32.mrb[12].mxu0  ;;  %1402 = vmatprep.subr.bf16.mxu1 %v1401_v51 }
  0xf0   :  { %v351_v53 = vpop.f32.mrb[13].mxu0  ;;  %1404 = vmatpush3.bf16.msra.mxu1 %v1401_v51 }
  0xf1   :  { %v1405_v54 = vpack.c.bf16 %v1209_v52, %v351_v53 }
  0xf3   :  { %v1212_v55 = vpop.f32.mrb[14].mxu0  ;;  %1406 = vmatprep.subr.bf16.mxu1 %v1405_v54 }
  0xf4   :  { %v361_v56 = vpop.f32.mrb[15].mxu0  ;;  %1408 = vmatpush3.bf16.msra.mxu1 %v1405_v54  ;;  %v98_v54 = vmax.f32 %v77_v35, 1.0 }
  0xf5   :  { %v1409_v57 = vpack.c.bf16 %v1212_v55, %v361_v56 }
  0xf7   :  { %1410 = vmatprep.subr.bf16.mxu1 %v1409_v57 }
  0xf8   :  { %1412 = vmatpush3.bf16.msra.mxu1 %v1409_v57 }
  0xfb   :  { %1246 = vmatmul.mubr.f32.vlgmr.msra.gmra.mrb[0].mxu1 %v1695_v1 }
  0xfc   :  { %1248 = vmatprep.mubr.f32.mxu1 %v1699_v2 }
  0xff   :  { %1249 = vmatmul.mubr.f32.gmra.mrb[2].mxu1 %v1701_v3 }
 0x100   :  { %1251 = vmatprep.mubr.f32.mxu1 %v1703_v4 }
 0x103   :  { %1252 = vmatmul.mubr.f32.gmra.mrb[4].mxu1 %v1705_v5 }
 0x104   :  { %1254 = vmatprep.mubr.f32.mxu1 %v1707_v6 }
 0x107   :  { %1255 = vmatmul.mubr.f32.gmra.mrb[6].mxu1 %v1709_v7 }
 0x108   :  { %1257 = vmatprep.mubr.f32.mxu1 %v1711_v8 }
 0x10b   :  { %1258 = vmatmul.mubr.f32.gmra.mrb[8].mxu1 %v1713_v9 }
 0x10c   :  { %1260 = vmatprep.mubr.f32.mxu1 %v1715_v10 }
 0x10f   :  { %1261 = vmatmul.mubr.f32.gmra.mrb[10].mxu1 %v1717_v11 }
 0x110   :  { %1263 = vmatprep.mubr.f32.mxu1 %v1719_v12 }
 0x113   :  { %1264 = vmatmul.mubr.f32.gmra.mrb[12].mxu1 %v1721_v13 }
 0x114   :  { %1266 = vmatprep.mubr.f32.mxu1 %v1723_v14 }
 0x117   :  { %1267 = vmatmul.mubr.f32.gmra.mrb[14].mxu1 %v1725_v15 }
 0x118   :  { %1366 = vmatprep.mubr.f32.mxu1 %v1707_v6  ;;  %v61_v6 = vpop.xlane.xlu1 %60 }
 0x119   :  { %v90_v26 = vmax.f32 %v61_v6, 1.0 }
 0x11c   :  { %v63_v17 = vpop.xlane.xlu1 %62 }
 0x11d   :  { %v91_v25 = vmax.f32 %v63_v17, 1.0  ;;  %v100_v17 = vmax.f32 %v81_v50, 1.0 }
 0x11f   :  { %1500 = vrsqrt.f32 %v91_v25 }
 0x120   :  { %v67_v19 = vpop.xlane.xlu1 %66  ;;  %1502 = vrsqrt.f32 %v90_v26 }
 0x121   :  { %v93_v28 = vmax.f32 %v67_v19, 1.0 }
 0x123   :  { %1504 = vrsqrt.f32 %v93_v28 }
 0x124   :  { %v71_v22 = vpop.xlane.xlu1 %70  ;;  %1506 = vrsqrt.f32 %v92_v30 }
 0x125   :  { %v95_v31 = vmax.f32 %v71_v22, 1.0  ;;  %v85_v22 = vpop.xlane.xlu0 %84 }
 0x127   :  { %1508 = vrsqrt.f32 %v95_v31  ;;  %v102_v31 = vmax.f32 %v85_v22, 1.0 }
 0x128   :  { %v75_v27 = vpop.xlane.xlu1 %74  ;;  %1510 = vrsqrt.f32 %v94_v32 }
 0x129   :  { %v97_v38 = vmax.f32 %v75_v27, 1.0  ;;  %v1801_v43 = vpop.eup %1500 }
 0x12a   :  { %v1806_v51 = vpop.eup %1502 }
 0x12b   :  { %1512 = vrsqrt.f32 %v97_v38 }
 0x12c   :  { %v79_v33 = vpop.xlane.xlu1 %78  ;;  %1514 = vrsqrt.f32 %v96_v42 }
 0x12d   :  { %v99_v49 = vmax.f32 %v79_v33, 1.0  ;;  %v1809_v55 = vpop.eup %1504 }
 0x12e   :  { %v1812_v58 = vpop.eup %1506 }
 0x12f   :  { %1516 = vrsqrt.f32 %v99_v49 }
 0x130   :  { %v83_v46 = vpop.xlane.xlu1 %82  ;;  %1518 = vrsqrt.f32 %v98_v54 }
 0x131   :  { %v101_v63 = vmax.f32 %v83_v46, 1.0  ;;  %v1817_v19 = vpop.eup %1508 }
 0x132   :  { %v1820_v23 = vpop.eup %1510 }
 0x133   :  { %1520 = vrsqrt.f32 %v101_v63 }
 0x134   :  { %v87_v18 = vpop.xlane.xlu1 %86  ;;  %1522 = vrsqrt.f32 %v100_v17 }
 0x135   :  { %v103_v28 = vmax.f32 %v87_v18, 1.0  ;;  %v1825_v32 = vpop.eup %1512 }
 0x137   :  { %1524 = vrsqrt.f32 %v103_v28 }
 0x138   :  { %1526 = vrsqrt.f32 %v102_v31 }
 0x1ce   :  { %v1247_v36 = vpop.f32.mrb[0].mxu1 }
 0x1cf   :  { %v516_v40 = vmul.f32 %v1791_v34, %v1247_v36  ;;  %v436_v41 = vpop.f32.mrb[1].mxu1  ;;  %v1828_v36 = vpop.eup %1514 }
 0x1d0   :  { %v515_v44 = vmul.f32 %v1798_v39, %v436_v41  ;;  %v1833_v46 = vpop.eup %1516 }
 0x1d1   :  { %v539_v45 = vadd.f32 %v1796_v37, %v516_v40  ;;  %v1836_v49 = vpop.eup %1518 }
 0x1d2   :  { %v538_v47 = vadd.f32 %v1796_v37, %v515_v44  ;;  %v1250_v48 = vpop.f32.mrb[2].mxu1 }
 0x1d3   :  { %v518_v52 = vmul.f32 %v1801_v43, %v1250_v48  ;;  %v446_v53 = vpop.f32.mrb[3].mxu1  ;;  %v555_v59 = vmax.f32 %v539_v45, 0.0 }
 0x1d4   :  { %v554_v56 = vmax.f32 %v538_v47, 0.0  ;;  %v517_v57 = vmul.f32 %v1806_v51, %v446_v53 }
 0x1d5   :  { %v541_v60 = vadd.f32 %v1796_v37, %v518_v52 }
 0x1d6   :  { %v540_v61 = vadd.f32 %v1796_v37, %v517_v57  ;;  %v1253_v62 = vpop.f32.mrb[4].mxu1  ;;  %1301 = vmatprep.mubr.f32.mxu0 %v554_v56 }
 0x1d7   :  { %v520_v6 = vmul.f32 %v1809_v55, %v1253_v62  ;;  %v456_v16 = vpop.f32.mrb[5].mxu1  ;;  %1302 = vmatmul.mubr.f32.vlgmr.msra.gmra.mrb[16].mxu0 %v555_v59  ;;  %v557_v24 = vmax.f32 %v541_v60, 0.0  ;;  %v1841_v59 = vpop.eup %1520 }
 0x1d8   :  { %v556_v20 = vmax.f32 %v540_v61, 0.0  ;;  %v519_v21 = vmul.f32 %v1812_v58, %v456_v16  ;;  %v1844_v62 = vpop.eup %1522 }
 0x1d9   :  { %v543_v25 = vadd.f32 %v1796_v37, %v520_v6 }
 0x1da   :  { %v542_v26 = vadd.f32 %v1796_v37, %v519_v21  ;;  %v1256_v27 = vpop.f32.mrb[6].mxu1  ;;  %1304 = vmatprep.mubr.f32.mxu0 %v556_v20  ;;  %v1849_v21 = vpop.eup %1524 }
 0x1db   :  { %v522_v29 = vmul.f32 %v1817_v19, %v1256_v27  ;;  %v466_v30 = vpop.f32.mrb[7].mxu1  ;;  %1305 = vmatmul.mubr.f32.gmra.mrb[18].mxu0 %v557_v24  ;;  %v559_v38 = vmax.f32 %v543_v25, 0.0  ;;  %v1852_v25 = vpop.eup %1526 }
 0x1dc   :  { %v558_v33 = vmax.f32 %v542_v26, 0.0  ;;  %v521_v35 = vmul.f32 %v1820_v23, %v466_v30 }
 0x1dd   :  { %v545_v40 = vadd.f32 %v1796_v37, %v522_v29 }
 0x1de   :  { %v544_v41 = vadd.f32 %v1796_v37, %v521_v35  ;;  %v1259_v42 = vpop.f32.mrb[8].mxu1  ;;  %1307 = vmatprep.mubr.f32.mxu0 %v558_v33 }
 0x1df   :  { %v524_v44 = vmul.f32 %v1825_v32, %v1259_v42  ;;  %v476_v45 = vpop.f32.mrb[9].mxu1  ;;  %1308 = vmatmul.mubr.f32.gmra.mrb[20].mxu0 %v559_v38  ;;  %v561_v50 = vmax.f32 %v545_v40, 0.0 }
 0x1e0   :  { %v560_v47 = vmax.f32 %v544_v41, 0.0  ;;  %v523_v48 = vmul.f32 %v1828_v36, %v476_v45 }
 0x1e1   :  { %v547_v52 = vadd.f32 %v1796_v37, %v524_v44 }
 0x1e2   :  { %v546_v53 = vadd.f32 %v1796_v37, %v523_v48  ;;  %v1262_v54 = vpop.f32.mrb[10].mxu1  ;;  %1310 = vmatprep.mubr.f32.mxu0 %v560_v47 }
 0x1e3   :  { %v526_v56 = vmul.f32 %v1833_v46, %v1262_v54  ;;  %v486_v57 = vpop.f32.mrb[11].mxu1  ;;  %1311 = vmatmul.mubr.f32.gmra.mrb[22].mxu0 %v561_v50  ;;  %v563_v63 = vmax.f32 %v547_v52, 0.0 }
 0x1e4   :  { %v562_v60 = vmax.f32 %v546_v53, 0.0  ;;  %v525_v61 = vmul.f32 %v1836_v49, %v486_v57 }
 0x1e5   :  { %v549_v6 = vadd.f32 %v1796_v37, %v526_v56 }
 0x1e6   :  { %v548_v16 = vadd.f32 %v1796_v37, %v525_v61  ;;  %v1265_v17 = vpop.f32.mrb[12].mxu1  ;;  %1313 = vmatprep.mubr.f32.mxu0 %v562_v60 }
 0x1e7   :  { %v528_v18 = vmul.f32 %v1841_v59, %v1265_v17  ;;  %v496_v20 = vpop.f32.mrb[13].mxu1  ;;  %1314 = vmatmul.mubr.f32.gmra.mrb[24].mxu0 %v563_v63  ;;  %v565_v26 = vmax.f32 %v549_v6, 0.0 }
 0x1e8   :  { %v564_v22 = vmax.f32 %v548_v16, 0.0  ;;  %v527_v24 = vmul.f32 %v1844_v62, %v496_v20 }
 0x1e9   :  { %v551_v27 = vadd.f32 %v1796_v37, %v528_v18 }
 0x1ea   :  { %v550_v28 = vadd.f32 %v1796_v37, %v527_v24  ;;  %v1268_v29 = vpop.f32.mrb[14].mxu1  ;;  %1316 = vmatprep.mubr.f32.mxu0 %v564_v22 }
 0x1eb   :  { %v530_v30 = vmul.f32 %v1849_v21, %v1268_v29  ;;  %v506_v31 = vpop.f32.mrb[15].mxu1  ;;  %1317 = vmatmul.mubr.f32.gmra.mrb[26].mxu0 %v565_v26  ;;  %v567_v38 = vmax.f32 %v551_v27, 0.0 }
 0x1ec   :  { %v566_v33 = vmax.f32 %v550_v28, 0.0  ;;  %v529_v35 = vmul.f32 %v1852_v25, %v506_v31 }
 0x1ed   :  { %v553_v40 = vadd.f32 %v1796_v37, %v530_v30 }
 0x1ee   :  { %v552_v41 = vadd.f32 %v1796_v37, %v529_v35  ;;  %1319 = vmatprep.mubr.f32.mxu0 %v566_v33 }
 0x1ef   :  { %1320 = vmatmul.mubr.f32.gmra.mrb[28].mxu0 %v567_v38  ;;  %v569_v44 = vmax.f32 %v553_v40, 0.0 }
 0x1f0   :  { %v568_v42 = vmax.f32 %v552_v41, 0.0 }
 0x1f2   :  { %1322 = vmatprep.mubr.f32.mxu0 %v568_v42 }
 0x1f3   :  { %1323 = vmatmul.mubr.f32.gmra.mrb[30].mxu0 %v569_v44 }
 0x1f4   :  { %1357 = vmatprep.mubr.f32.mxu0 %v1692_v0 }
 0x2aa   :  { %v1303_v45 = vpop.f32.mrb[16].mxu0 }
 0x2ab   :  { %v652_v47 = vpop.f32.mrb[17].mxu0 }
 0x2ac   :  { %v1445_v48 = vpack.c.bf16 %v1303_v45, %v652_v47 }
 0x2ae   :  { %v1306_v50 = vpop.f32.mrb[18].mxu0  ;;  %1446 = vmatprep.subr.bf16.mxu0 %v1445_v48  ;;  %1477 = vmatprep.subr.bf16.mxu1 %v1445_v48 }
 0x2af   :  { %v662_v52 = vpop.f32.mrb[19].mxu0  ;;  %1448 = vmatpush3.bf16.msra.mxu0 %v1445_v48  ;;  %1485 = vmatpush3.bf16.msra.mxu1 %v1445_v48 }
 0x2b0   :  { %v1449_v53 = vpack.c.bf16 %v1306_v50, %v662_v52 }
 0x2b2   :  { %v1309_v54 = vpop.f32.mrb[20].mxu0  ;;  %1450 = vmatprep.subr.bf16.mxu0 %v1449_v53  ;;  %1478 = vmatprep.subr.bf16.mxu1 %v1449_v53 }
 0x2b3   :  { %v672_v37 = vpop.f32.mrb[21].mxu0  ;;  %1452 = vmatpush3.bf16.msra.mxu0 %v1449_v53  ;;  %1486 = vmatpush3.bf16.msra.mxu1 %v1449_v53 }
 0x2b4   :  { %v1453_v56 = vpack.c.bf16 %v1309_v54, %v672_v37 }
 0x2b6   :  { %v1312_v57 = vpop.f32.mrb[22].mxu0  ;;  %1454 = vmatprep.subr.bf16.mxu0 %v1453_v56  ;;  %1479 = vmatprep.subr.bf16.mxu1 %v1453_v56 }
 0x2b7   :  { %v682_v0 = vpop.f32.mrb[23].mxu0  ;;  %1456 = vmatpush3.bf16.msra.mxu0 %v1453_v56  ;;  %1487 = vmatpush3.bf16.msra.mxu1 %v1453_v56 }
 0x2b8   :  { %v1457_v60 = vpack.c.bf16 %v1312_v57, %v682_v0 }
 0x2ba   :  { %v1315_v61 = vpop.f32.mrb[24].mxu0  ;;  %1458 = vmatprep.subr.bf16.mxu0 %v1457_v60  ;;  %1480 = vmatprep.subr.bf16.mxu1 %v1457_v60 }
 0x2bb   :  { %v692_v63 = vpop.f32.mrb[25].mxu0  ;;  %1460 = vmatpush3.bf16.msra.mxu0 %v1457_v60  ;;  %1488 = vmatpush3.bf16.msra.mxu1 %v1457_v60 }
 0x2bc   :  { %v1461_v6 = vpack.c.bf16 %v1315_v61, %v692_v63 }
 0x2be   :  { %v1318_v16 = vpop.f32.mrb[26].mxu0  ;;  %1462 = vmatprep.subr.bf16.mxu0 %v1461_v6  ;;  %1481 = vmatprep.subr.bf16.mxu1 %v1461_v6 }
 0x2bf   :  { %v702_v17 = vpop.f32.mrb[27].mxu0  ;;  %1464 = vmatpush3.bf16.msra.mxu0 %v1461_v6  ;;  %1489 = vmatpush3.bf16.msra.mxu1 %v1461_v6 }
 0x2c0   :  { %v1465_v18 = vpack.c.bf16 %v1318_v16, %v702_v17 }
 0x2c2   :  { %v1321_v20 = vpop.f32.mrb[28].mxu0  ;;  %1466 = vmatprep.subr.bf16.mxu0 %v1465_v18  ;;  %1482 = vmatprep.subr.bf16.mxu1 %v1465_v18 }
 0x2c3   :  { %v712_v22 = vpop.f32.mrb[29].mxu0  ;;  %1468 = vmatpush3.bf16.msra.mxu0 %v1465_v18  ;;  %1490 = vmatpush3.bf16.msra.mxu1 %v1465_v18 }
 0x2c4   :  { %v1469_v24 = vpack.c.bf16 %v1321_v20, %v712_v22 }
 0x2c6   :  { %v1324_v26 = vpop.f32.mrb[30].mxu0  ;;  %1470 = vmatprep.subr.bf16.mxu0 %v1469_v24  ;;  %1483 = vmatprep.subr.bf16.mxu1 %v1469_v24 }
 0x2c7   :  { %v722_v27 = vpop.f32.mrb[31].mxu0  ;;  %1472 = vmatpush3.bf16.msra.mxu0 %v1469_v24  ;;  %1491 = vmatpush3.bf16.msra.mxu1 %v1469_v24 }
 0x2c8   :  { %v1473_v28 = vpack.c.bf16 %v1324_v26, %v722_v27 }
 0x2ca   :  { %1474 = vmatprep.subr.bf16.mxu0 %v1473_v28  ;;  %1484 = vmatprep.subr.bf16.mxu1 %v1473_v28 }
 0x2cb   :  { %1476 = vmatpush3.bf16.msra.mxu0 %v1473_v28  ;;  %1492 = vmatpush3.bf16.msra.mxu1 %v1473_v28 }
 0x2ce   :  { %1358 = vmatmul.mubr.f32.vlgmr.msra.gmra.mrb[32].mxu0 %v1695_v1  ;;  %1367 = vmatmul.mubr.f32.vlgmr.msra.gmra.mrb[16].mxu1 %v1709_v7 }
 0x2cf   :  { %1360 = vmatprep.mubr.f32.mxu0 %v1699_v2  ;;  %1369 = vmatprep.mubr.f32.mxu1 %v1711_v8  ;;  %v1878_v2 = vld [vmem:[%s1929_s5] ss:$0 sm:$0xff]  ;;  %s1552_s5 = smov [#allocation2]  }
 0x2d0   :  { %s1009_s26 = sshll.u32 %s1552_s5, 4  ;;  %s1010_s26 = int_to_ptr.vmem [resolvable:$true] %s1009_s26 }
 0x2d1   :  { %s1528_s27 = scalar_lea.vmem %s1010_s26, 128  ;;  %p1533_p1 = scmp.lt.s32.totalorder %s1010_s26, %s1010_s26 }
 0x2d2   :  { %1361 = vmatmul.mubr.f32.gmra.mrb[34].mxu0 %v1701_v3  ;;  %1370 = vmatmul.mubr.f32.gmra.mrb[18].mxu1 %v1713_v9  ;;  %p1529_p0 = scmp.ne.s32.totalorder %s1010_s26, %s1528_s27  ;;  %p1534_p2 = scmp.lt.s32.totalorder %s1528_s27, %s1528_s27 }
 0x2d3   :  { %1363 = vmatprep.mubr.f32.mxu0 %v1703_v4  ;;  %1372 = vmatprep.mubr.f32.mxu1 %v1715_v10 }
 0x2d4   :  { %p1535_p3 = por %p1534_p2, %p1533_p1 }
 0x2d6   :  { %1364 = vmatmul.mubr.f32.gmra.mrb[36].mxu0 %v1705_v5  ;;  %1373 = vmatmul.mubr.f32.gmra.mrb[20].mxu1 %v1717_v11  ;;  %p1536_p4 = pnand %p1535_p3, %p1529_p0 }
 0x2d7   :  { %1375 = vmatprep.mubr.f32.mxu1 %v1719_v12 }
 0x2da   :  { %1376 = vmatmul.mubr.f32.gmra.mrb[22].mxu1 %v1721_v13 }
 0x2db   :  { %1378 = vmatprep.mubr.f32.mxu1 %v1723_v14 }
 0x2de   :  { %1379 = vmatmul.mubr.f32.gmra.mrb[24].mxu1 %v1725_v15 }
 0x3a1   :  { %v1359_v1 = vpop.f32.mrb[32].mxu0  ;;  %v1368_v3 = vpop.f32.mrb[16].mxu1 }
 0x3a2   :  { %v877_v4 = vmul.f32 %v1791_v34, %v1359_v1  ;;  %v883_v5 = vmul.f32 %v1817_v19, %v1368_v3  ;;  %v797_v7 = vpop.f32.mrb[33].mxu0  ;;  %v827_v8 = vpop.f32.mrb[17].mxu1 }
 0x3a3   :  { %v876_v9 = vmul.f32 %v1798_v39, %v797_v7  ;;  %v882_v10 = vmul.f32 %v1820_v23, %v827_v8 }
 0x3a4   :  { %v900_v11 = vadd.f32 %v1878_v2, %v877_v4  ;;  %v906_v12 = vadd.f32 %v1878_v2, %v883_v5 }
 0x3a5   :  { %v899_v13 = vadd.f32 %v1878_v2, %v876_v9  ;;  %v905_v14 = vadd.f32 %v1878_v2, %v882_v10  ;;  %v1362_v15 = vpop.f32.mrb[34].mxu0  ;;  %v1371_v29 = vpop.f32.mrb[18].mxu1 }
 0x3a6   :  { %v879_v34 = vmul.f32 %v1801_v43, %v1362_v15  ;;  %v885_v19 = vmul.f32 %v1825_v32, %v1371_v29  ;;  %v807_v30 = vpop.f32.mrb[35].mxu0  ;;  %v837_v31 = vpop.f32.mrb[19].mxu1 }
 0x3a7   :  { %v915_v33 = vadd.f32 %v900_v11, %v899_v13  ;;  %v936_v39 = vadd.f32 %v906_v12, %v905_v14  ;;  %v878_v23 = vmul.f32 %v1806_v51, %v807_v30  ;;  %v884_v35 = vmul.f32 %v1828_v36, %v837_v31 }
 0x3a8   :  { %v902_v38 = vadd.f32 %v1878_v2, %v879_v34  ;;  %v908_v40 = vadd.f32 %v1878_v2, %v885_v19 }
 0x3a9   :  { %v916_v41 = vrot.slane %v915_v33, 4  ;;  %v937_v42 = vrot.slane %v936_v39, 4  ;;  %v901_v44 = vadd.f32 %v1878_v2, %v878_v23  ;;  %v907_v43 = vadd.f32 %v1878_v2, %v884_v35  ;;  %v1365_v45 = vpop.f32.mrb[36].mxu0  ;;  %v1374_v32 = vpop.f32.mrb[20].mxu1 }
 0x3aa   :  { %v881_v47 = vmul.f32 %v1809_v55, %v1365_v45  ;;  %v887_v48 = vmul.f32 %v1833_v46, %v1374_v32  ;;  %v817_v50 = vpop.f32.mrb[37].mxu0  ;;  %v847_v51 = vpop.f32.mrb[21].mxu1 }
 0x3ab   :  { %v917_v52 = vadd.f32 %v916_v41, %v915_v33  ;;  %v938_v36 = vadd.f32 %v937_v42, %v936_v39  ;;  %v922_v53 = vadd.f32 %v902_v38, %v901_v44  ;;  %v943_v54 = vadd.f32 %v908_v40, %v907_v43 }
 0x3ac   :  { %v904_v37 = vadd.f32 %v1878_v2, %v881_v47  ;;  %v910_v56 = vadd.f32 %v1878_v2, %v887_v48  ;;  %v880_v57 = vmul.f32 %v1812_v58, %v817_v50  ;;  %v886_v0 = vmul.f32 %v1836_v49, %v847_v51 }
 0x3ad   :  { %v918_v60 = vrot.slane %v917_v52, 2  ;;  %v923_v61 = vrot.slane %v922_v53, 4  ;;  %v944_v63 = vrot.slane %v943_v54, 4  ;;  %v1377_v55 = vpop.f32.mrb[22].mxu1  ;;  %v939_v20 = vrot.slane %v938_v36, 2 }
 0x3ae   :  { %v903_v46 = vadd.f32 %v1878_v2, %v880_v57  ;;  %v909_v6 = vadd.f32 %v1878_v2, %v886_v0  ;;  %v889_v16 = vmul.f32 %v1841_v59, %v1377_v55  ;;  %v857_v17 = vpop.f32.mrb[23].mxu1 }
 0x3af   :  { %v919_v18 = vadd.f32 %v918_v60, %v917_v52  ;;  %v924_v22 = vadd.f32 %v923_v61, %v922_v53  ;;  %v945_v24 = vadd.f32 %v944_v63, %v943_v54  ;;  %v888_v49 = vmul.f32 %v1844_v62, %v857_v17 }
 0x3b0   :  { %v929_v26 = vadd.f32 %v904_v37, %v903_v46  ;;  %v950_v27 = vadd.f32 %v910_v56, %v909_v6  ;;  %v912_v58 = vadd.f32 %v1878_v2, %v889_v16  ;;  %v940_v10 = vadd.f32 %v939_v20, %v938_v36 }
 0x3b1   :  { %v920_v28 = vrot.slane %v919_v18, 1  ;;  %v925_v1 = vrot.slane %v924_v22, 2  ;;  %v946_v3 = vrot.slane %v945_v24, 2  ;;  %v1380_v4 = vpop.f32.mrb[24].mxu1  ;;  %v911_v8 = vadd.f32 %v1878_v2, %v888_v49 }
 0x3b2   :  { %v930_v5 = vrot.slane %v929_v26, 4  ;;  %v951_v7 = vrot.slane %v950_v27, 4  ;;  %v891_v59 = vmul.f32 %v1849_v21, %v1380_v4  ;;  %v867_v9 = vpop.f32.mrb[25].mxu1  ;;  %v941_v39 = vrot.slane %v940_v10, 1 }
 0x3b3   :  { %v926_v11 = vadd.f32 %v925_v1, %v924_v22  ;;  %v947_v12 = vadd.f32 %v946_v3, %v945_v24  ;;  %v957_v15 = vadd.f32 %v912_v58, %v911_v8  ;;  %v921_v29 = vadd.f32 %v920_v28, %v919_v18 }
 0x3b4   :  { %v931_v13 = vadd.f32 %v930_v5, %v929_v26  ;;  %v952_v14 = vadd.f32 %v951_v7, %v950_v27  ;;  %v914_v62 = vadd.f32 %v1878_v2, %v891_v59  ;;  %v890_v33 = vmul.f32 %v1852_v25, %v867_v9 }
 0x3b5   :  { %v927_v34 = vrot.slane %v926_v11, 1  ;;  %v958_v31 = vrot.slane %v957_v15, 4  ;;  %v948_v35 = vrot.slane %v947_v12, 1  ;;  %v971_v42 = vmul.f32 0.0625, %v921_v29 }
 0x3b6   :  { %v932_v19 = vrot.slane %v931_v13, 2  ;;  %v953_v30 = vrot.slane %v952_v14, 2  ;;  %v913_v41 = vadd.f32 %v1878_v2, %v890_v33  ;;  %v942_v48 = vadd.f32 %v941_v39, %v940_v10 }
 0x3b7   :  { %v928_v23 = vadd.f32 %v927_v34, %v926_v11  ;;  %v959_v40 = vadd.f32 %v958_v31, %v957_v15  ;;  %v949_v51 = vadd.f32 %v948_v35, %v947_v12 }
 0x3b8   :  { %v933_v21 = vadd.f32 %v932_v19, %v931_v13  ;;  %v954_v38 = vadd.f32 %v953_v30, %v952_v14  ;;  %v964_v47 = vadd.f32 %v914_v62, %v913_v41  ;;  %v974_v57 = vmul.f32 0.0625, %v942_v48 }
 0x3b9   :  { %v972_v44 = vmul.f32 0.0625, %v928_v23  ;;  %v960_v32 = vrot.slane %v959_v40, 2  ;;  %v975_v2 = vmul.f32 0.0625, %v949_v51 }
 0x3ba   :  { %v934_v43 = vrot.slane %v933_v21, 1  ;;  %v955_v45 = vrot.slane %v954_v38, 1  ;;  %v965_v36 = vrot.slane %v964_v47, 4 }
 0x3bb   :  { %v988_v50 = vsel %vm987_vm1, %v972_v44, %v971_v42  ;;  %v961_v25 = vadd.f32 %v960_v32, %v959_v40 }
 0x3bc   :  { %v935_v52 = vadd.f32 %v934_v43, %v933_v21  ;;  %v956_v53 = vadd.f32 %v955_v45, %v954_v38  ;;  %v966_v56 = vadd.f32 %v965_v36, %v964_v47 }
 0x3bd   :  { %v962_v37 = vrot.slane %v961_v25, 1 }
 0x3be   :  { %v973_v54 = vmul.f32 0.0625, %v935_v52  ;;  %v967_v0 = vrot.slane %v966_v56, 2  ;;  %v976_v63 = vmul.f32 0.0625, %v956_v53 }
 0x3bf   :  { %v963_v60 = vadd.f32 %v962_v37, %v961_v25 }
 0x3c0   :  { %v990_v61 = vsel %vm989_vm2, %v973_v54, %v988_v50  ;;  %v968_v46 = vadd.f32 %v967_v0, %v966_v56 }
 0x3c1   :  { %v992_v55 = vsel %vm991_vm3, %v974_v57, %v990_v61  ;;  %v977_v6 = vmul.f32 0.0625, %v963_v60 }
 0x3c2   :  { %v994_v16 = vsel %vm993_vm4, %v975_v2, %v992_v55  ;;  %v969_v18 = vrot.slane %v968_v46, 1 }
 0x3c3   :  { %v996_v17 = vsel %vm995_vm5, %v976_v63, %v994_v16 }
 0x3c4   :  { %v998_v20 = vsel %vm997_vm6, %v977_v6, %v996_v17  ;;  %v970_v22 = vadd.f32 %v969_v18, %v968_v46 }
 0x3c6   :  { %v978_v24 = vmul.f32 0.0625, %v970_v22 }
 0x3c8   :  { %v1000_v26 = vsel %vm999_vm7, %v978_v24, %v998_v20 }
 0x3c9   :  { %1002 = vst [vmem:[#allocation2] sm:$0xff] %v1000_v26 }
 0x3ca   :  { %1539 = shalt.err (!%p1536_p4)
}
 0x3cb   :  { %s1540_s29 = scalar_lea.hbm %s1930_s6, 128 }
 0x3cc   :  { %p1541_p5 = scmp.ne.s32.totalorder %s1930_s6, %s1540_s29  ;;  %p1544_p6 = scmp.lt.u32.totalorder %s1540_s29, %s1930_s6 }
 0x3ce   :  { %p1546_p7 = pnand %p1544_p6, %p1541_p5 }
 0x3d0   :  { %1549 = shalt.err (!%p1546_p7)
}
 0x3d1   :  { %1012 = dma.vmem_to_hbm [thread:$0]  %s1010_s26, 128, %s1930_s6, [#allocation3]  }
 0x3d2   :  { %1550 = dma.done.wait [#allocation3], 128  }
 0x3d3   :  { %1551 = vsyncadd [#allocation3], 4294967168 }
 0x3d4   :  { %1016 = vsyncpa [#allocation3], 1 }

</bundles_post_ra>
